<compile_context>
chip_gen: v7x
topology: tpu7x:2x2x1
jax: 0.10.0
libtpu: 0.0.40
codegen_flags: <defaults>
</compile_context>

<pallas_src>
import functools

import jax
import jax.numpy as jnp
from jax.experimental import pallas as pl
from jax.experimental.pallas import tpu as pltpu


# ---------------------------------------------------------------------------
# Shared-range-reduction sin/cos (f32 accuracy, cephes coefficients).
# ---------------------------------------------------------------------------
_TWO_OVER_PI = 0.6366197723675814
# pi/2 split into three f32-exact-ish pieces (2x cephes DP1/DP2/DP3).
_PIO2_HI = 1.5703125
_PIO2_MED = 4.837512969970703125e-4
_PIO2_LO = 7.54978995489188216e-8
# sin(r) on [-pi/4, pi/4]
_S1 = -1.6666654611e-1
_S2 = 8.3321608736e-3
_S3 = -1.9515295891e-4
# cos(r) on [-pi/4, pi/4]
_C1 = 4.166664568298827e-2
_C2 = -1.388731625493765e-3
_C3 = 2.443315711809948e-5


def _sincos(x):
    """(sin(x), cos(x)) computed from one shared range reduction.

    q = round(x * 2/pi), r = x - q*pi/2 (3-term Cody-Waite), then short
    minimax polynomials for sin(r) and cos(r); quadrant handled with cheap
    integer bit tests + selects.  Roughly half the VALU cost of calling
    jnp.sin and jnp.cos independently.
    """
    q_f = jnp.floor(x * _TWO_OVER_PI + 0.5)
    q = q_f.astype(jnp.int32)
    r = x - q_f * _PIO2_HI
    r = r - q_f * _PIO2_MED
    r = r - q_f * _PIO2_LO
    z = r * r
    sin_r = r + r * z * (_S1 + z * (_S2 + z * _S3))
    cos_r = 1.0 - 0.5 * z + z * z * (_C1 + z * (_C2 + z * _C3))
    swap = (q & 1) == 1                       # odd quadrant: swap sin/cos
    sin_q = jnp.where(swap, cos_r, sin_r)
    cos_q = jnp.where(swap, sin_r, cos_r)
    sin_x = jnp.where((q & 2) == 2, -sin_q, sin_q)
    cos_x = jnp.where(((q + 1) & 2) == 2, -cos_q, cos_q)
    return sin_x, cos_x


# ---------------------------------------------------------------------------
# Kernel.
# ---------------------------------------------------------------------------
def _pos_embed_kernel(pos_ref, inv_ref, out_ref, *, half: int):
    # pos_ref: (TS, 1) f32   inv_ref: (1, half) f32   out_ref: (TS, 2*half)
    sinusoid = pos_ref[...] * inv_ref[...]            # outer product (TS, half)
    sin_x, cos_x = _sincos(sinusoid)

    if half % 128 == 0:
        # Lane-dense, aligned direct half writes: no concat temp, unmasked vst.
        out_ref[:, :half] = sin_x.astype(out_ref.dtype)
        out_ref[:, half:] = cos_x.astype(out_ref.dtype)
    else:
        # Small / lane-unaligned embed dims: single full-tile store (tile is
        # tiny here; avoids relying on unaligned lane-offset stores).
        out_ref[...] = jnp.concatenate([sin_x, cos_x], axis=-1).astype(out_ref.dtype)


# ---------------------------------------------------------------------------
# Wrapper.
# ---------------------------------------------------------------------------
def _round_up(x: int, m: int) -> int:
    return ((x + m - 1) // m) * m


def _choose_tile_rows(seq_len: int, embed_dim: int,
                      *, target_block_bytes: int = 2 << 20,
                      max_rows: int = 4096) -> int:
    """Byte-adaptive row tile; guarantees >=2 grid steps when seq_len > 8."""
    if seq_len <= 8:
        return seq_len
    rows = max(8, min(max_rows, target_block_bytes // (embed_dim * 4)))
    # >= 2 grid steps so both v7x TensorCores get work on the parallel axis.
    rows = min(rows, _round_up(pl.cdiv(seq_len, 2), 8))
    rows = _round_up(rows, 8)
    return min(rows, _round_up(seq_len, 8))


def _make_inv_freq(embed_dim: int) -> jax.Array:
    # Exactly the PyTorch buffer:  1 / 10000 ** (arange(0, D, 2) / D)
    freq_seq = jnp.arange(0.0, float(embed_dim), 2.0, dtype=jnp.float32)
    return 1.0 / (10000.0 ** (freq_seq / float(embed_dim)))


def positional_embedding(pos_seq: jax.Array, embed_dim: int,
                         *, out_dtype=jnp.float32) -> jax.Array:
    """Equivalent of texar PositionalEmbedding.forward(pos_seq)."""
    assert embed_dim % 2 == 0
    half = embed_dim // 2

    seq_len = pos_seq.shape[0]
    pos2d = pos_seq.astype(jnp.float32).reshape(seq_len, 1)      # (S, 1)
    inv_freq = _make_inv_freq(embed_dim).reshape(1, half)        # (1, half)

    ts = _choose_tile_rows(seq_len, embed_dim)
    grid = (pl.cdiv(seq_len, ts),)

    kernel = functools.partial(_pos_embed_kernel, half=half)

    out = pl.pallas_call(
        kernel,
        out_shape=jax.ShapeDtypeStruct((seq_len, embed_dim), out_dtype),
        grid=grid,
        in_specs=[
            pl.BlockSpec((ts, 1), lambda i: (i, 0)),     # pos rows
            pl.BlockSpec((1, half), lambda i: (0, 0)),   # inv_freq (fetched once)
        ],
        out_specs=pl.BlockSpec((ts, embed_dim), lambda i: (i, 0)),
        compiler_params=pltpu.CompilerParams(
            dimension_semantics=("parallel",),
        ),
        cost_estimate=pl.CostEstimate(
            flops=seq_len * half * 30,
            transcendentals=0,
            bytes_accessed=seq_len * embed_dim * jnp.dtype(out_dtype).itemsize
            + seq_len * 4 + half * 4,
        ),
    )(pos2d, inv_freq)
    return out


# ---------------------------------------------------------------------------
# Pure-JAX reference (mirrors the PyTorch module).
# ---------------------------------------------------------------------------
def _reference(pos_seq: jax.Array, embed_dim: int) -> jax.Array:
    inv_freq = _make_inv_freq(embed_dim)
    sinusoid = jnp.outer(pos_seq.astype(jnp.float32), inv_freq)
    return jnp.concatenate([jnp.sin(sinusoid), jnp.cos(sinusoid)], axis=-1)


if __name__ == "__main__":
    key = jax.random.PRNGKey(0)
    k1, k2 = jax.random.split(key)

    def _check(seq_len, embed_dim, k):
        # Typical XLNet usage: pos_seq is a reversed / shifted float range.
        base = jnp.arange(seq_len - 1, -1, -1, dtype=jnp.float32)
        shift = jax.random.uniform(k, (), minval=-2.0, maxval=2.0)
        pos_seq = base + shift
        out = jax.block_until_ready(positional_embedding(pos_seq, embed_dim))
        ref = _reference(pos_seq, embed_dim)
        assert out.shape == (seq_len, embed_dim), out.shape
        assert jnp.allclose(out, ref, atol=1e-5, rtol=1e-5), (
            float(jnp.max(jnp.abs(out - ref))))

    # Small, lane-unaligned half (concat fallback path), single grid step.
    _check(8, 32, k1)
    # Lane-aligned half (direct half stores) with a 2-step grid.
    _check(48, 256, k2)

    print("KERNEL_OK")
</pallas_src>

<mosaic_0001>
module attributes {stable_mosaic.version = 11 : i64} {
  func.func @_pos_embed_kernel(%arg0: i32, %arg1: memref<8x1xf32, #tpu.memory_space<vmem>>, %arg2: memref<1x16xf32, #tpu.memory_space<vmem>>, %arg3: memref<8x32xf32, #tpu.memory_space<vmem>>) attributes {dimension_semantics = [#tpu.dimension_semantics<parallel>], iteration_bounds = array<i64: 1>, scalar_prefetch = 0 : i64, scratch_operands = 0 : i64, tpu.core_type = #tpu.core_type<tc>, window_params = [{transform_indices = @transform_0, window_bounds = array<i64: 8, 1>}, {pipeline_mode = #tpu.pipeline_mode<synchronous>, transform_indices = @transform_1, window_bounds = array<i64: 1, 16>}, {transform_indices = @transform_2, window_bounds = array<i64: 8, 32>}]} {
    %c0 = arith.constant 0 : index
    %c0_0 = arith.constant 0 : index
    %0 = vector.load %arg1[%c0, %c0_0] : memref<8x1xf32, #tpu.memory_space<vmem>>, vector<8x1xf32>
    %c0_1 = arith.constant 0 : index
    %c0_2 = arith.constant 0 : index
    %1 = vector.load %arg2[%c0_1, %c0_2] : memref<1x16xf32, #tpu.memory_space<vmem>>, vector<1x16xf32>
    %2 = vector.broadcast %0 : vector<8x1xf32> to vector<8x16xf32>
    %3 = vector.broadcast %1 : vector<1x16xf32> to vector<8x16xf32>
    %4 = arith.mulf %2, %3 : vector<8x16xf32>
    %cst = arith.constant 0.636619746 : f32
    %5 = vector.broadcast %cst : f32 to vector<8x16xf32>
    %6 = arith.mulf %4, %5 : vector<8x16xf32>
    %cst_3 = arith.constant 5.000000e-01 : f32
    %7 = vector.broadcast %cst_3 : f32 to vector<8x16xf32>
    %8 = arith.addf %6, %7 : vector<8x16xf32>
    %9 = math.floor %8 : vector<8x16xf32>
    %10 = arith.fptosi %9 : vector<8x16xf32> to vector<8x16xi32>
    %cst_4 = arith.constant 1.5703125 : f32
    %11 = vector.broadcast %cst_4 : f32 to vector<8x16xf32>
    %12 = arith.mulf %9, %11 : vector<8x16xf32>
    %13 = arith.subf %4, %12 : vector<8x16xf32>
    %cst_5 = arith.constant 4.83751297E-4 : f32
    %14 = vector.broadcast %cst_5 : f32 to vector<8x16xf32>
    %15 = arith.mulf %9, %14 : vector<8x16xf32>
    %16 = arith.subf %13, %15 : vector<8x16xf32>
    %cst_6 = arith.constant 7.549790e-08 : f32
    %17 = vector.broadcast %cst_6 : f32 to vector<8x16xf32>
    %18 = arith.mulf %9, %17 : vector<8x16xf32>
    %19 = arith.subf %16, %18 : vector<8x16xf32>
    %20 = arith.mulf %19, %19 : vector<8x16xf32>
    %21 = arith.mulf %19, %20 : vector<8x16xf32>
    %cst_7 = arith.constant -1.95152956E-4 : f32
    %22 = vector.broadcast %cst_7 : f32 to vector<8x16xf32>
    %23 = arith.mulf %20, %22 : vector<8x16xf32>
    %cst_8 = arith.constant 0.00833216123 : f32
    %24 = vector.broadcast %cst_8 : f32 to vector<8x16xf32>
    %25 = arith.addf %24, %23 : vector<8x16xf32>
    %26 = arith.mulf %20, %25 : vector<8x16xf32>
    %cst_9 = arith.constant -0.166666552 : f32
    %27 = vector.broadcast %cst_9 : f32 to vector<8x16xf32>
    %28 = arith.addf %27, %26 : vector<8x16xf32>
    %29 = arith.mulf %21, %28 : vector<8x16xf32>
    %30 = arith.addf %19, %29 : vector<8x16xf32>
    %cst_10 = arith.constant 5.000000e-01 : f32
    %31 = vector.broadcast %cst_10 : f32 to vector<8x16xf32>
    %32 = arith.mulf %31, %20 : vector<8x16xf32>
    %cst_11 = arith.constant 1.000000e+00 : f32
    %33 = vector.broadcast %cst_11 : f32 to vector<8x16xf32>
    %34 = arith.subf %33, %32 : vector<8x16xf32>
    %35 = arith.mulf %20, %20 : vector<8x16xf32>
    %cst_12 = arith.constant 2.44331568E-5 : f32
    %36 = vector.broadcast %cst_12 : f32 to vector<8x16xf32>
    %37 = arith.mulf %20, %36 : vector<8x16xf32>
    %cst_13 = arith.constant -0.00138873165 : f32
    %38 = vector.broadcast %cst_13 : f32 to vector<8x16xf32>
    %39 = arith.addf %38, %37 : vector<8x16xf32>
    %40 = arith.mulf %20, %39 : vector<8x16xf32>
    %cst_14 = arith.constant 0.0416666456 : f32
    %41 = vector.broadcast %cst_14 : f32 to vector<8x16xf32>
    %42 = arith.addf %41, %40 : vector<8x16xf32>
    %43 = arith.mulf %35, %42 : vector<8x16xf32>
    %44 = arith.addf %34, %43 : vector<8x16xf32>
    %c1_i32 = arith.constant 1 : i32
    %45 = vector.broadcast %c1_i32 : i32 to vector<8x16xi32>
    %46 = arith.andi %10, %45 : vector<8x16xi32>
    %c1_i32_15 = arith.constant 1 : i32
    %47 = vector.broadcast %c1_i32_15 : i32 to vector<8x16xi32>
    %48 = arith.cmpi eq, %46, %47 : vector<8x16xi32>
    %49 = arith.select %48, %44, %30 : vector<8x16xi1>, vector<8x16xf32>
    %50 = arith.select %48, %30, %44 : vector<8x16xi1>, vector<8x16xf32>
    %c2_i32 = arith.constant 2 : i32
    %51 = vector.broadcast %c2_i32 : i32 to vector<8x16xi32>
    %52 = arith.andi %10, %51 : vector<8x16xi32>
    %c2_i32_16 = arith.constant 2 : i32
    %53 = vector.broadcast %c2_i32_16 : i32 to vector<8x16xi32>
    %54 = arith.cmpi eq, %52, %53 : vector<8x16xi32>
    %cst_17 = arith.constant 0.000000e+00 : f32
    %55 = vector.broadcast %cst_17 : f32 to vector<8x16xf32>
    %56 = arith.subf %55, %49 : vector<8x16xf32>
    %57 = arith.select %54, %56, %49 : vector<8x16xi1>, vector<8x16xf32>
    %c1_i32_18 = arith.constant 1 : i32
    %58 = vector.broadcast %c1_i32_18 : i32 to vector<8x16xi32>
    %59 = arith.addi %10, %58 : vector<8x16xi32>
    %c2_i32_19 = arith.constant 2 : i32
    %60 = vector.broadcast %c2_i32_19 : i32 to vector<8x16xi32>
    %61 = arith.andi %59, %60 : vector<8x16xi32>
    %c2_i32_20 = arith.constant 2 : i32
    %62 = vector.broadcast %c2_i32_20 : i32 to vector<8x16xi32>
    %63 = arith.cmpi eq, %61, %62 : vector<8x16xi32>
    %cst_21 = arith.constant 0.000000e+00 : f32
    %64 = vector.broadcast %cst_21 : f32 to vector<8x16xf32>
    %65 = arith.subf %64, %50 : vector<8x16xf32>
    %66 = arith.select %63, %65, %50 : vector<8x16xi1>, vector<8x16xf32>
    %67 = tpu.concatenate %57, %66 in 1 : vector<8x16xf32>, vector<8x16xf32> -> vector<8x32xf32>
    %c0_22 = arith.constant 0 : index
    %c0_23 = arith.constant 0 : index
    %68 = vector.load %arg3[%c0_22, %c0_23] : memref<8x32xf32, #tpu.memory_space<vmem>>, vector<8x32xf32>
    tpu.vector_store %arg3[%c0_22, %c0_23], %67 {strides = array<i32>} : memref<8x32xf32, #tpu.memory_space<vmem>>, vector<8x32xf32>,
    return
  }
  func.func @transform_0(%arg0: i32) -> (i32, i32) {
    %c0_i32 = arith.constant 0 : i32
    %c0_i32_0 = arith.constant 0 : i32
    return %arg0, %c0_i32 : i32, i32
  }
  func.func @transform_1(%arg0: i32) -> (i32, i32) {
    %c0_i32 = arith.constant 0 : i32
    %c0_i32_0 = arith.constant 0 : i32
    %c0_i32_1 = arith.constant 0 : i32
    return %c0_i32, %c0_i32_0 : i32, i32
  }
  func.func @transform_2(%arg0: i32) -> (i32, i32) {
    %c0_i32 = arith.constant 0 : i32
    %c0_i32_0 = arith.constant 0 : i32
    return %arg0, %c0_i32 : i32, i32
  }
}

</mosaic_0001>

<bundles_post_ra>
// kernel: tpu_custom_call.1
= control target key start
LH: loop header
LB: loop body
LE: loop exit
PB: predicated region body
PF: predicated region fallthrough
CT: control target
= control target key end

     0   :  { %s155_s0 = inlined_call_operand.vmem [shape: f32[8,1], index: 0, kind: input, shape index: {}]   ;;  %s156_s1 = inlined_call_operand.vmem [shape: f32[1,16], index: 1, kind: input, shape index: {}]   ;;  %s157_s2 = inlined_call_operand.hbm [shape: f32[8,32], index: 2, kind: output, shape index: {}]  }
   0x1   :  { %v12_v0 = vld [vmem:[%s155_s0] sm:$0xff] }
   0x2   :  { %7 = vsyncpa [#allocation3], 0  ;;  %v119_v1 = vmov 0   ;;  %v88_v2 = vld [vmem:[%s156_s1] ss:$0 sm:$0xff]  ;;  %s120_s0 = smov 16  }
   0x3   :  { %94 = vset.pattern.permute.xlu0 %v119_v1  ;;  %s121_s1 = smov [#allocation2]   ;;  %vm70_vm3 = vcmask 130048   ;;  %vm72_vm4 = vcmask 261120  }
   0x4   :  { %16 = vperm.xlu0 %94, %v12_v0   ;;  %s80_s13 = sshll.u32 %s121_s1, 4  ;;  %s81_s13 = int_to_ptr.vmem [resolvable:$true] %s80_s13 }
   0x5   :  { %s95_s14 = scalar_lea.vmem %s81_s13, 128  ;;  %p100_p1 = scmp.lt.s32.totalorder %s81_s13, %s81_s13 }
   0x6   :  { %p96_p0 = scmp.ne.s32.totalorder %s81_s13, %s95_s14  ;;  %p101_p2 = scmp.lt.s32.totalorder %s95_s14, %s95_s14 }
   0x8   :  { %p102_p3 = por %p101_p2, %p100_p1 }
   0xa   :  { %p103_p4 = pnand %p102_p3, %p96_p0 }
  0x83   :  { %v17_v3 = vpop.permute.xlu0 %16 }
  0x84   :  { %v25_v4 = vmul.f32 %v88_v2, %v17_v3 }
  0x86   :  { %v26_v5 = vmul.f32 0.63661975, %v25_v4 }
  0x88   :  { %v27_v6 = vadd.f32 0.5, %v26_v5 }
  0x8a   :  { %v28_v7 = vfloor.f32 %v27_v6 }
  0x8c   :  { %v30_v8 = vmul.f32 1.5703125, %v28_v7  ;;  %v32_v10 = vmul.f32 0.0004837513, %v28_v7  ;;  %v34_v12 = vmul.f32 7.54979e-08, %v28_v7  ;;  %v89_v15 = vtrunc.f32 %v28_v7 }
  0x8e   :  { %v31_v9 = vsub.f32 %v25_v4, %v30_v8  ;;  %v90_v19 = vcvt.f32.s32 %v89_v15 }
  0x90   :  { %v33_v11 = vsub.f32 %v31_v9, %v32_v10  ;;  %v61_v28 = vadd.s32 1, %v90_v19  ;;  %v53_v30 = vand.u32 1, %v90_v19  ;;  %v57_v36 = vand.u32 2, %v90_v19 }
  0x92   :  { %v35_v13 = vsub.f32 %v33_v11, %v34_v12  ;;  %v62_v35 = vand.u32 2, %v61_v28  ;;  %vm54_vm0 = vcmp.eq.s32.totalorder %v53_v30, 1  ;;  %vm58_vm2 = vcmp.eq.s32.totalorder %v57_v36, 2 }
  0x94   :  { %v36_v14 = vmul.f32 %v35_v13, %v35_v13  ;;  %vm63_vm1 = vcmp.eq.s32.totalorder %v62_v35, 2 }
  0x96   :  { %v38_v16 = vmul.f32 -0.00019515296, %v36_v14  ;;  %v47_v17 = vmul.f32 2.4433157e-05, %v36_v14  ;;  %v44_v22 = vmul.f32 0.5, %v36_v14  ;;  %v37_v24 = vmul.f32 %v36_v14, %v35_v13 }
  0x97   :  { %v46_v26 = vmul.f32 %v36_v14, %v36_v14 }
  0x98   :  { %v39_v18 = vadd.f32 0.008332161, %v38_v16  ;;  %v48_v20 = vadd.f32 -0.0013887316, %v47_v17  ;;  %v45_v31 = vsub.f32 1.0, %v44_v22 }
  0x9a   :  { %v40_v21 = vmul.f32 %v39_v18, %v36_v14  ;;  %v49_v23 = vmul.f32 %v48_v20, %v36_v14 }
  0x9c   :  { %v41_v25 = vadd.f32 -0.16666655, %v40_v21  ;;  %v50_v27 = vadd.f32 0.041666646, %v49_v23 }
  0x9e   :  { %v42_v29 = vmul.f32 %v41_v25, %v37_v24  ;;  %v51_v32 = vmul.f32 %v50_v27, %v46_v26 }
  0xa0   :  { %v43_v33 = vadd.f32 %v42_v29, %v35_v13  ;;  %v52_v34 = vadd.f32 %v51_v32, %v45_v31 }
  0xa2   :  { %v56_v37 = vsel %vm54_vm0, %v43_v33, %v52_v34  ;;  %v55_v38 = vsel %vm54_vm0, %v52_v34, %v43_v33 }
  0xa3   :  { %v64_v39 = vsub.f32 0.0, %v56_v37  ;;  %v59_v40 = vsub.f32 0.0, %v55_v38 }
  0xa5   :  { %v65_v41 = vsel %vm63_vm1, %v64_v39, %v56_v37  ;;  %v60_v42 = vsel %vm58_vm2, %v59_v40, %v55_v38 }
  0xa6   :  { %67 = vrot.lane.b32.xlu0 %v65_v41, %s120_s0 }
 0x118   :  { %v68_v43 = vpop.permute.xlu0 %67 }
 0x119   :  { %v71_v44 = vsel %vm70_vm3, %v60_v42, %v68_v43 }
 0x11a   :  { %73 = vst.msk [vmem:[#allocation2] sm:$0xff] %vm72_vm4, %v71_v44 }
 0x11b   :  { %106 = shalt.err (!%p103_p4)
}
 0x11c   :  { %s107_s17 = scalar_lea.hbm %s157_s2, 128 }
 0x11d   :  { %p108_p5 = scmp.ne.s32.totalorder %s157_s2, %s107_s17  ;;  %p111_p6 = scmp.lt.u32.totalorder %s107_s17, %s157_s2 }
 0x11f   :  { %p113_p7 = pnand %p111_p6, %p108_p5 }
 0x121   :  { %116 = shalt.err (!%p113_p7)
}
 0x122   :  { %83 = dma.vmem_to_hbm [thread:$0]  %s81_s13, 128, %s157_s2, [#allocation3]  }
 0x123   :  { %117 = dma.done.wait [#allocation3], 128  }
 0x124   :  { %118 = vsyncadd [#allocation3], 4294967168 }
 0x125   :  { %87 = vsyncpa [#allocation3], 1 }

</bundles_post_ra>
